<compile_context>
chip_gen: v5e
topology: v5e:2x2
jax: 0.10.0
libtpu: 0.0.40
codegen_flags: <defaults>
</compile_context>

<pallas_src>
import functools

import jax
import jax.numpy as jnp
from jax import lax
from jax.experimental import pallas as pl
from jax.experimental.pallas import tpu as pltpu

_HIGHEST = jax.lax.Precision.HIGHEST  # full-f32 MXU contraction (matches reference)


# ---------------------------------------------------------------------------
# Kernel 1: tiled linear (x @ w + b) for the qk projection.
# ---------------------------------------------------------------------------
def _linear_bias_kernel(x_ref, w_ref, b_ref, o_ref, acc_ref):
    @pl.when(pl.program_id(2) == 0)
    def _():
        acc_ref[...] = jnp.zeros_like(acc_ref)

    acc_ref[...] += jnp.dot(
        x_ref[...], w_ref[...],
        preferred_element_type=jnp.float32, precision=_HIGHEST)

    @pl.when(pl.program_id(2) == pl.num_programs(2) - 1)
    def _():
        o_ref[...] = (acc_ref[...] + b_ref[...].astype(jnp.float32)).astype(o_ref.dtype)


def pallas_linear(x, w, b, *, tm=128, tn=128, tk=256):
    """x: (M, K), w: (K, N), b: (N,) -> (M, N)."""
    M, K = x.shape
    Kw, N = w.shape
    assert K == Kw
    tm, tn, tk = min(tm, M), min(tn, N), min(tk, K)
    assert M % tm == 0 and N % tn == 0 and K % tk == 0, (M, N, K, tm, tn, tk)
    b2 = b.reshape(1, N)
    return pl.pallas_call(
        _linear_bias_kernel,
        out_shape=jax.ShapeDtypeStruct((M, N), x.dtype),
        grid_spec=pltpu.PrefetchScalarGridSpec(
            num_scalar_prefetch=0,
            grid=(M // tm, N // tn, K // tk),
            in_specs=[
                pl.BlockSpec((tm, tk), lambda i, j, k: (i, k)),
                pl.BlockSpec((tk, tn), lambda i, j, k: (k, j)),
                pl.BlockSpec((1, tn), lambda i, j, k: (0, j)),
            ],
            out_specs=pl.BlockSpec((tm, tn), lambda i, j, k: (i, j)),
            scratch_shapes=[pltpu.VMEM((tm, tn), jnp.float32)],
        ),
        compiler_params=pltpu.CompilerParams(
            dimension_semantics=("parallel", "parallel", "arbitrary")),
    )(x, w, b2)


# ---------------------------------------------------------------------------
# Kernel 2: fused attention (QK^T -> online softmax -> PV), flash-style.
# ---------------------------------------------------------------------------
def _flash_attn_kernel(q_ref, k_ref, v_ref, o_ref, m_scr, l_scr, acc_scr, *, scale):
    kv = pl.program_id(2)

    @pl.when(kv == 0)
    def _():
        m_scr[...] = jnp.full_like(m_scr, -jnp.inf)
        l_scr[...] = jnp.zeros_like(l_scr)
        acc_scr[...] = jnp.zeros_like(acc_scr)

    # s = (q @ k^T) * scale on the MXU, f32 accumulation, no explicit transpose.
    s = lax.dot_general(
        q_ref[...], k_ref[...], (((1,), (1,)), ((), ())),
        preferred_element_type=jnp.float32, precision=_HIGHEST) * scale

    m_prev = m_scr[...]
    m_new = jnp.maximum(m_prev, s.max(axis=-1, keepdims=True))
    alpha = jnp.exp(m_prev - m_new)
    p = jnp.exp(s - m_new)
    l_scr[...] = alpha * l_scr[...] + p.sum(axis=-1, keepdims=True)
    acc_scr[...] = alpha * acc_scr[...] + jnp.dot(
        p.astype(v_ref.dtype), v_ref[...],
        preferred_element_type=jnp.float32, precision=_HIGHEST)
    m_scr[...] = m_new

    @pl.when(kv == pl.num_programs(2) - 1)
    def _():
        o_ref[...] = (acc_scr[...] / l_scr[...]).astype(o_ref.dtype)

    # TODO(synk): causal_mask=True branch (triu mask on s) not implemented;
    #             module default is causal_mask=False.
    # TODO(synk): dropout>0 on attention weights not implemented; module
    #             default dropout=0.0 is nn.Identity.


def pallas_flash_attention(q, k, v, scale, *, tq=128, tk=128):
    """q, k: (BH, S, Dqk); v: (BH, S, Dv) -> (BH, S, Dv)."""
    BH, S, dqk = q.shape
    dv = v.shape[-1]
    tq, tk = min(tq, S), min(tk, S)
    assert S % tq == 0 and S % tk == 0, (S, tq, tk)
    kernel = functools.partial(_flash_attn_kernel, scale=float(scale))
    return pl.pallas_call(
        kernel,
        out_shape=jax.ShapeDtypeStruct((BH, S, dv), q.dtype),
        grid_spec=pltpu.PrefetchScalarGridSpec(
            num_scalar_prefetch=0,
            grid=(BH, S // tq, S // tk),
            in_specs=[
                pl.BlockSpec((None, tq, dqk), lambda b, i, j: (b, i, 0)),
                pl.BlockSpec((None, tk, dqk), lambda b, i, j: (b, j, 0)),
                pl.BlockSpec((None, tk, dv), lambda b, i, j: (b, j, 0)),
            ],
            out_specs=pl.BlockSpec((None, tq, dv), lambda b, i, j: (b, i, 0)),
            scratch_shapes=[
                pltpu.VMEM((tq, 1), jnp.float32),   # running max  m
                pltpu.VMEM((tq, 1), jnp.float32),   # running sum  l
                pltpu.VMEM((tq, dv), jnp.float32),  # accumulator  acc
            ],
        ),
        compiler_params=pltpu.CompilerParams(
            dimension_semantics=("parallel", "parallel", "arbitrary")),
    )(q, k, v)


# ---------------------------------------------------------------------------
# Full SelfAttention forward (default config: v/out are nn.Identity).
# ---------------------------------------------------------------------------
def self_attention_forward(x, w_qk, b_qk, *, num_heads, tq=128, tk=128):
    B, S, D = x.shape
    assert D % num_heads == 0
    head_qk = w_qk.shape[1] // (2 * num_heads)
    head_v = D // num_heads            # v == nn.Identity (input_dim == v_dim)
    scale = head_qk ** -0.5

    qk = pallas_linear(x.reshape(B * S, D), w_qk, b_qk)
    qk = qk.reshape(B, S, num_heads, head_qk, 2)        # 'b s (h d c)'
    q = jnp.transpose(qk[..., 0], (0, 2, 1, 3)).reshape(B * num_heads, S, head_qk)
    k = jnp.transpose(qk[..., 1], (0, 2, 1, 3)).reshape(B * num_heads, S, head_qk)
    v = jnp.transpose(x.reshape(B, S, num_heads, head_v), (0, 2, 1, 3)).reshape(
        B * num_heads, S, head_v)

    out = pallas_flash_attention(q, k, v, scale, tq=tq, tk=tk)
    out = out.reshape(B, num_heads, S, head_v)
    out = jnp.transpose(out, (0, 2, 1, 3)).reshape(B, S, num_heads * head_v)
    return out                                          # out == nn.Identity


# ---------------------------------------------------------------------------
# Plain-JAX reference (mirrors the PyTorch forward exactly).
# ---------------------------------------------------------------------------
def self_attention_reference(x, w_qk, b_qk, *, num_heads):
    B, S, D = x.shape
    head_qk = w_qk.shape[1] // (2 * num_heads)
    head_v = D // num_heads
    scale = head_qk ** -0.5
    qk = jnp.einsum('bsd,de->bse', x, w_qk, precision=_HIGHEST) + b_qk
    qk = qk.reshape(B, S, num_heads, head_qk, 2)
    q = jnp.transpose(qk[..., 0], (0, 2, 1, 3))
    k = jnp.transpose(qk[..., 1], (0, 2, 1, 3))
    v = jnp.transpose(x.reshape(B, S, num_heads, head_v), (0, 2, 1, 3))
    sim = jnp.einsum('bhid,bhjd->bhij', q, k, precision=_HIGHEST) * scale
    attn = jax.nn.softmax(sim, axis=-1)
    out = jnp.einsum('bhij,bhjd->bhid', attn, v, precision=_HIGHEST)
    return jnp.transpose(out, (0, 2, 1, 3)).reshape(B, S, num_heads * head_v)


if __name__ == "__main__":
    key = jax.random.PRNGKey(0)
    k_x, k_w = jax.random.split(key)

    # SelfAttention(input_dim=32, num_heads=4) defaults -> head_qk = head_v = 8,
    # v = Identity, out = Identity.  x: (B=2, S=64, D=32).
    B, S, D, H = 2, 64, 32, 4
    x = jax.random.normal(k_x, (B, S, D), dtype=jnp.float32)
    # lecun_normal_ (fan_in = D) for the qk Linear weight; zero bias.
    w_qk = jax.random.normal(k_w, (D, 2 * D), dtype=jnp.float32) * (D ** -0.5)
    b_qk = jnp.zeros((2 * D,), dtype=jnp.float32)

    # tq=32 / tk=16 exercises multi-tile q and a multi-step online-softmax kv
    # reduction at this small demo size; use tq=tk=128 (v5e) / 256 (v6e, v7x
    # VMEM-budget permitting) for production sequence lengths.
    out = self_attention_forward(x, w_qk, b_qk, num_heads=H, tq=32, tk=16)
    out = jax.block_until_ready(out)

    ref = self_attention_reference(x, w_qk, b_qk, num_heads=H)
    assert out.shape == (B, S, D) and out.dtype == x.dtype
    max_err = float(jnp.max(jnp.abs(out - ref)))
    assert jnp.allclose(out, ref, atol=2e-5, rtol=2e-5), max_err

    print("KERNEL_OK")
</pallas_src>

<mosaic_0001>
module attributes {stable_mosaic.version = 11 : i64} {
  func.func @_linear_bias_kernel(%arg0: i32, %arg1: i32, %arg2: i32, %arg3: memref<128x32xf32, #tpu.memory_space<vmem>>, %arg4: memref<32x64xf32, #tpu.memory_space<vmem>>, %arg5: memref<1x64xf32, #tpu.memory_space<vmem>>, %arg6: memref<128x64xf32, #tpu.memory_space<vmem>>, %arg7: memref<128x64xf32, #tpu.memory_space<vmem>>) attributes {dimension_semantics = [#tpu.dimension_semantics<parallel>, #tpu.dimension_semantics<parallel>, #tpu.dimension_semantics<arbitrary>], iteration_bounds = array<i64: 1, 1, 1>, scalar_prefetch = 0 : i64, scratch_operands = 1 : i64, tpu.core_type = #tpu.core_type<tc>, window_params = [{transform_indices = @transform_0, window_bounds = array<i64: 128, 32>}, {transform_indices = @transform_1, window_bounds = array<i64: 32, 64>}, {transform_indices = @transform_2, window_bounds = array<i64: 1, 64>}, {transform_indices = @transform_3, window_bounds = array<i64: 128, 64>}]} {
    %c0_i32 = arith.constant 0 : i32
    %0 = arith.cmpi eq, %arg2, %c0_i32 : i32
    %1 = arith.extui %0 : i1 to i32
    %c0_i32_0 = arith.constant 0 : i32
    %2 = arith.cmpi ne, %1, %c0_i32_0 : i32
    scf.if %2 {
      %cst_10 = arith.constant 0.000000e+00 : f32
      %12 = vector.broadcast %cst_10 : f32 to vector<128x64xf32>
      %c0_11 = arith.constant 0 : index
      %c0_12 = arith.constant 0 : index
      %13 = vector.load %arg7[%c0_11, %c0_12] : memref<128x64xf32, #tpu.memory_space<vmem>>, vector<128x64xf32>
      tpu.vector_store %arg7[%c0_11, %c0_12], %12 {strides = array<i32>} : memref<128x64xf32, #tpu.memory_space<vmem>>, vector<128x64xf32>,
    } else {
    }
    %c0 = arith.constant 0 : index
    %c0_1 = arith.constant 0 : index
    %3 = vector.load %arg7[%c0, %c0_1] : memref<128x64xf32, #tpu.memory_space<vmem>>, vector<128x64xf32>
    %c0_2 = arith.constant 0 : index
    %c0_3 = arith.constant 0 : index
    %4 = vector.load %arg3[%c0_2, %c0_3] : memref<128x32xf32, #tpu.memory_space<vmem>>, vector<128x32xf32>
    %c0_4 = arith.constant 0 : index
    %c0_5 = arith.constant 0 : index
    %5 = vector.load %arg4[%c0_4, %c0_5] : memref<32x64xf32, #tpu.memory_space<vmem>>, vector<32x64xf32>
    %cst = arith.constant dense<0.000000e+00> : vector<128x64xf32>
    %6 = tpu.matmul %4, %5, %cst {dimension_numbers = #tpu.dot_dimension_numbers<[1], [0], [0], [1], [0, 0, 1, 1], [], []>, precision = #tpu.contract_precision<fp32>} : vector<128x32xf32>, vector<32x64xf32>, vector<128x64xf32> -> vector<128x64xf32>
    %7 = arith.addf %3, %6 : vector<128x64xf32>
    %c0_6 = arith.constant 0 : index
    %c0_7 = arith.constant 0 : index
    %8 = vector.load %arg7[%c0_6, %c0_7] : memref<128x64xf32, #tpu.memory_space<vmem>>, vector<128x64xf32>
    tpu.vector_store %arg7[%c0_6, %c0_7], %7 {strides = array<i32>} : memref<128x64xf32, #tpu.memory_space<vmem>>, vector<128x64xf32>,
    %c0_i32_8 = arith.constant 0 : i32
    %9 = arith.cmpi eq, %arg2, %c0_i32_8 : i32
    %10 = arith.extui %9 : i1 to i32
    %c0_i32_9 = arith.constant 0 : i32
    %11 = arith.cmpi ne, %10, %c0_i32_9 : i32
    scf.if %11 {
      %c0_10 = arith.constant 0 : index
      %c0_11 = arith.constant 0 : index
      %12 = vector.load %arg7[%c0_10, %c0_11] : memref<128x64xf32, #tpu.memory_space<vmem>>, vector<128x64xf32>
      %c0_12 = arith.constant 0 : index
      %c0_13 = arith.constant 0 : index
      %13 = vector.load %arg5[%c0_12, %c0_13] : memref<1x64xf32, #tpu.memory_space<vmem>>, vector<1x64xf32>
      %14 = vector.broadcast %13 : vector<1x64xf32> to vector<128x64xf32>
      %15 = arith.addf %12, %14 : vector<128x64xf32>
      %c0_14 = arith.constant 0 : index
      %c0_15 = arith.constant 0 : index
      %16 = vector.load %arg6[%c0_14, %c0_15] : memref<128x64xf32, #tpu.memory_space<vmem>>, vector<128x64xf32>
      tpu.vector_store %arg6[%c0_14, %c0_15], %15 {strides = array<i32>} : memref<128x64xf32, #tpu.memory_space<vmem>>, vector<128x64xf32>,
    } else {
    }
    return
  }
  func.func @transform_0(%arg0: i32, %arg1: i32, %arg2: i32) -> (i32, i32) {
    %c0_i32 = arith.constant 0 : i32
    return %arg0, %arg2 : i32, i32
  }
  func.func @transform_1(%arg0: i32, %arg1: i32, %arg2: i32) -> (i32, i32) {
    %c0_i32 = arith.constant 0 : i32
    return %arg2, %arg1 : i32, i32
  }
  func.func @transform_2(%arg0: i32, %arg1: i32, %arg2: i32) -> (i32, i32) {
    %c0_i32 = arith.constant 0 : i32
    %c0_i32_0 = arith.constant 0 : i32
    return %c0_i32, %arg1 : i32, i32
  }
  func.func @transform_3(%arg0: i32, %arg1: i32, %arg2: i32) -> (i32, i32) {
    %c0_i32 = arith.constant 0 : i32
    return %arg0, %arg1 : i32, i32
  }
}

</mosaic_0001>

<bundles_post_ra>
// kernel: tpu_custom_call.1
= control target key start
LH: loop header
LB: loop body
LE: loop exit
PB: predicated region body
PF: predicated region fallthrough
CT: control target
= control target key end

     0   :  { %vm71_vm0 = vcmask 261120   ;;  %vm18_vm1 = vcmask 523264   ;;  %s1411_s1 = inlined_call_operand.vmem [shape: f32[32,64], index: 1, kind: input, shape index: {}]   ;;  %s1412_s0 = inlined_call_operand.vmem [shape: f32[128,32], index: 0, kind: input, shape index: {}]   ;;  %s1413_s2 = inlined_call_operand.vmem [shape: f32[1,64], index: 2, kind: input, shape index: {}]   ;;  %s1414_s3 = inlined_call_operand.vmem [shape: f32[128,64], index: 3, kind: output, shape index: {}]  }
   0x1   :  { %v70_v0 = vld [vmem:[%s1411_s1 + $0x18] sm:$0xff]  ;;  %v69_v1 = vld [vmem:[%s1411_s1 + $0x10] sm:$0xff]  ;;  %v68_v2 = vld [vmem:[%s1411_s1 + $0x8] sm:$0xff] }
   0x2   :  { %v902_v3 = vand.u32 4294901760, %v70_v0  ;;  %v904_v4 = vand.u32 4294901760, %v69_v1  ;;  %v906_v5 = vand.u32 4294901760, %v68_v2  ;;  %v67_v6 = vld [vmem:[%s1411_s1] sm:$0xff]  ;;  %v60_v8 = vld [vmem:[%s1412_s0 + $0x48] sm:$0xff]  ;;  %v61_v13 = vld [vmem:[%s1412_s0 + $0x50] sm:$0xff] }
   0x3   :  { %v59_v7 = vld [vmem:[%s1412_s0 + $0x40] sm:$0xff]  ;;  %v917_v9 = vand.u32 4294901760, %v67_v6  ;;  %v100_v11 = vsel %vm71_vm0, %v60_v8, 0  ;;  %v103_v21 = vsel %vm71_vm0, %v61_v13, 0  ;;  %v52_v36 = vld [vmem:[%s1412_s0 + $0x8] sm:$0xff]  ;;  %v53_v37 = vld [vmem:[%s1412_s0 + $0x10] sm:$0xff] }
   0x4   :  { %v97_v10 = vsel %vm71_vm0, %v59_v7, 0  ;;  %v51_v12 = vld [vmem:[%s1412_s0] sm:$0xff]  ;;  %862 = vmatpush.msra.mxu2 %v902_v3  ;;  %v282_v14 = vsub.f32 %v70_v0, %v902_v3  ;;  %v288_v16 = vsub.f32 %v69_v1, %v904_v4  ;;  %v294_v17 = vsub.f32 %v68_v2, %v906_v5  ;;  %133 = vmatpush.msra.mxu0 %v902_v3  ;;  %v62_v46 = vld [vmem:[%s1412_s0 + $0x58] sm:$0xff] }
   0x5   :  { %v929_v15 = vand.u32 4294901760, %v97_v10  ;;  %v935_v18 = vsub.f32 %v67_v6, %v917_v9  ;;  %v937_v19 = vand.u32 4294901760, %v100_v11  ;;  %v73_v20 = vsel %vm71_vm0, %v51_v12, 0  ;;  %v54_v57 = vld [vmem:[%s1412_s0 + $0x18] sm:$0xff]  ;;  %v63_v1 = vld [vmem:[%s1412_s0 + $0x60] sm:$0xff] }
   0x6   :  { %863 = vmatpush.msra.mxu2 %v904_v4  ;;  %v283_v22 = vand.u32 4294901760, %v282_v14  ;;  %v289_v24 = vand.u32 4294901760, %v288_v16  ;;  %v295_v25 = vand.u32 4294901760, %v294_v17  ;;  %135 = vmatpush.msra.mxu0 %v904_v4  ;;  %v950_v28 = vand.u32 4294901760, %v73_v20 }
   0x7   :  { %v943_v23 = vsub.f32 %v97_v10, %v929_v15  ;;  %v301_v26 = vand.u32 4294901760, %v935_v18  ;;  %v948_v27 = vsub.f32 %v100_v11, %v937_v19  ;;  %v961_v35 = vand.u32 4294901760, %v103_v21  ;;  %v55_v11 = vld [vmem:[%s1412_s0 + $0x20] sm:$0xff] }
   0x8   :  { %864 = vmatpush.msra.mxu2 %v906_v5  ;;  %v284_v29 = vsub.f32 %v282_v14, %v283_v22  ;;  %v290_v31 = vsub.f32 %v288_v16, %v289_v24  ;;  %v296_v32 = vsub.f32 %v294_v17, %v295_v25  ;;  %137 = vmatpush.msra.mxu0 %v906_v5  ;;  %v76_v45 = vsel %vm71_vm0, %v52_v36, 0 }
   0x9   :  { %v206_v30 = vand.u32 4294901760, %v943_v23  ;;  %v302_v33 = vsub.f32 %v935_v18, %v301_v26  ;;  %v959_v34 = vsub.f32 %v73_v20, %v950_v28  ;;  %v214_v41 = vand.u32 4294901760, %v948_v27 }
   0xa   :  { %865 = vmatpush.msra.mxu2 %v917_v9  ;;  %v285_v38 = vand.u32 4294901760, %v284_v29  ;;  %v291_v40 = vand.u32 4294901760, %v290_v31  ;;  %139 = vmatpush.msra.mxu0 %v917_v9  ;;  %v297_v44 = vand.u32 4294901760, %v296_v32  ;;  %v79_v47 = vsel %vm71_vm0, %v53_v37, 0  ;;  %v65_v37 = vld [vmem:[%s1412_s0 + $0x70] sm:$0xff] }
   0xb   :  { %v207_v39 = vsub.f32 %v943_v23, %v206_v30  ;;  %v142_v42 = vand.u32 4294901760, %v959_v34  ;;  %v984_v49 = vand.u32 4294901760, %v76_v45  ;;  %v303_v50 = vand.u32 4294901760, %v302_v33 }
   0xc   :  { %384 = vmatpush.msrb.mxu2 %v282_v14  ;;  %607 = vmatpush.msrb.mxu0 %v283_v22  ;;  %v215_v51 = vsub.f32 %v948_v27, %v214_v41  ;;  %v990_v52 = vsub.f32 %v103_v21, %v961_v35  ;;  %v992_v53 = vand.u32 4294901760, %v79_v47  ;;  %v106_v56 = vsel %vm71_vm0, %v62_v46, 0  ;;  %v57_v46 = vld [vmem:[%s1412_s0 + $0x30] sm:$0xff] }
   0xd   :  { %866 = vmatpush.msra.mxu3 %v285_v38  ;;  %v208_v43 = vand.u32 4294901760, %v207_v39  ;;  %286 = vmatpush.msra.mxu1 %v285_v38  ;;  %v143_v48 = vsub.f32 %v959_v34, %v142_v42  ;;  %v995_v55 = vsub.f32 %v76_v45, %v984_v49  ;;  %v1006_v62 = vand.u32 4294901760, %v106_v56 }
   0xe   :  { %387 = vmatpush.msrb.mxu2 %v288_v16  ;;  %611 = vmatpush.msrb.mxu0 %v289_v24  ;;  %v1003_v59 = vsub.f32 %v79_v47, %v992_v53  ;;  %v216_v60 = vand.u32 4294901760, %v215_v51  ;;  %v222_v61 = vand.u32 4294901760, %v990_v52  ;;  %v82_v63 = vsel %vm71_vm0, %v54_v57, 0  ;;  %v66_v57 = vld [vmem:[%s1412_s0 + $0x78] sm:$0xff] }
   0xf   :  { %209 = vmatmul.f32.vlgmr.msra.gmra.mxu2 %v208_v43  ;;  %867 = vmatpush.msra.mxu3 %v291_v40  ;;  %v144_v54 = vand.u32 4294901760, %v143_v48  ;;  %v150_v58 = vand.u32 4294901760, %v995_v55  ;;  %v1021_v7 = vand.u32 4294901760, %v82_v63  ;;  %v1030_v10 = vsub.f32 %v106_v56, %v1006_v62 }
  0x10   :  { %292 = vmatpush.msra.mxu1 %v291_v40  ;;  %390 = vmatpush.msrb.mxu2 %v294_v17  ;;  %v158_v6 = vand.u32 4294901760, %v1003_v59  ;;  %v223_v8 = vsub.f32 %v990_v52, %v222_v61  ;;  %v85_v17 = vsel %vm71_vm0, %v55_v11, 0  ;;  %v115_v45 = vsel %vm71_vm0, %v65_v37, 0 }
  0x11   :  { %868 = vmatpush.msra.mxu3 %v297_v44  ;;  %615 = vmatpush.msrb.mxu0 %v295_v25  ;;  %v151_v0 = vsub.f32 %v995_v55, %v150_v58  ;;  %v1042_v13 = vsub.f32 %v82_v63, %v1021_v7  ;;  %v230_v16 = vand.u32 4294901760, %v1030_v10  ;;  %v1057_v21 = vand.u32 4294901760, %v85_v17  ;;  %v56_v25 = vld [vmem:[%s1412_s0 + $0x28] sm:$0xff] }
  0x12   :  { %298 = vmatpush.msra.mxu1 %v297_v44  ;;  %145 = vmatmul.f32.vlgmr.msra.gmra.mxu0 %v144_v54  ;;  %v159_v12 = vsub.f32 %v1003_v59, %v158_v6  ;;  %v224_v14 = vand.u32 4294901760, %v223_v8  ;;  %v88_v36 = vsel %vm71_vm0, %v56_v25, 0  ;;  %v1104_v54 = vand.u32 4294901760, %v115_v45 }
  0x13   :  { %869 = vmatpush.msra.mxu3 %v303_v50  ;;  %393 = vmatpush.msrb.mxu2 %v935_v18  ;;  %v152_v2 = vand.u32 4294901760, %v151_v0  ;;  %v64_v18 = vld [vmem:[%s1412_s0 + $0x68] sm:$0xff]  ;;  %v166_v20 = vand.u32 4294901760, %v1042_v13  ;;  %v231_v22 = vsub.f32 %v1030_v10, %v230_v16  ;;  %v1073_v29 = vsub.f32 %v85_v17, %v1057_v21 }
  0x14   :  { %338 = vmatmul.f32.vlgmr.msra.gmra.mxu3 %v929_v15  ;;  %304 = vmatpush.msra.mxu1 %v303_v50  ;;  %v1085_v40 = vand.u32 4294901760, %v88_v36  ;;  %v91_v56 = vsel %vm71_vm0, %v57_v46, 0  ;;  %v118_v8 = vsel %vm71_vm0, %v66_v57, 0 }
  0x15   :  { %488 = vmatpush.msrb.mxu3 %v902_v3  ;;  %306 = vmatmul.f32.vlgmr.msra.gmra.mxu1 %v950_v28  ;;  %v232_v31 = vand.u32 4294901760, %v231_v22  ;;  %v174_v39 = vand.u32 4294901760, %v1073_v29  ;;  %v1113_v0 = vand.u32 4294901760, %v91_v56 }
  0x16   :  { %698 = vmatpush.msrb.mxu1 %v902_v3  ;;  %619 = vmatpush.msrb.mxu0 %v301_v26  ;;  %v109_v3 = vsel %vm71_vm0, %v63_v1, 0  ;;  %v167_v26 = vsub.f32 %v1042_v13, %v166_v20  ;;  %v1101_v48 = vsub.f32 %v88_v36, %v1085_v40 }
  0x17   :  { %217 = vmatmul.f32.gmra.mxu2 %v216_v60  ;;  %490 = vmatpush.msrb.mxu3 %v904_v4  ;;  %v175_v47 = vsub.f32 %v1073_v29, %v174_v39 }
  0x18   :  { %700 = vmatpush.msrb.mxu1 %v904_v4  ;;  %v1046_v4 = vand.u32 4294901760, %v109_v3  ;;  %v168_v38 = vand.u32 4294901760, %v167_v26  ;;  %v182_v63 = vand.u32 4294901760, %v1101_v48 }
  0x19   :  { %492 = vmatpush.msrb.mxu3 %v906_v5  ;;  %v176_v60 = vand.u32 4294901760, %v175_v47 }
  0x1a   :  { %153 = vmatmul.f32.gmra.mxu0 %v152_v2  ;;  %702 = vmatpush.msrb.mxu1 %v906_v5  ;;  %v160_v5 = vand.u32 4294901760, %v159_v12  ;;  %v1063_v24 = vsub.f32 %v109_v3, %v1046_v4  ;;  %v1119_v2 = vsub.f32 %v115_v45, %v1104_v54  ;;  %v58_v3 = vld [vmem:[%s1412_s0 + $0x38] sm:$0xff]  ;;  %v183_v11 = vsub.f32 %v1101_v48, %v182_v63 }
  0x1b   :  { %494 = vmatpush.msrb.mxu3 %v917_v9  ;;  %v189_v12 = vsub.f32 %v91_v56, %v1113_v0 }
  0x1c   :  { %342 = vmatmul.f32.gmra.mxu3 %v937_v19  ;;  %704 = vmatpush.msrb.mxu1 %v917_v9  ;;  %v112_v9 = vsel %vm71_vm0, %v64_v18, 0  ;;  %v238_v32 = vand.u32 4294901760, %v1063_v24  ;;  %v254_v17 = vand.u32 4294901760, %v1119_v2  ;;  %v1130_v18 = vand.u32 4294901760, %v118_v8 }
  0x1d   :  { %310 = vmatmul.f32.gmra.mxu1 %v984_v49  ;;  %v1076_v33 = vand.u32 4294901760, %v112_v9  ;;  %v184_v22 = vand.u32 4294901760, %v183_v11 }
  0x1e   :  { %v239_v43 = vsub.f32 %v1063_v24, %v238_v32  ;;  %v255_v26 = vsub.f32 %v1119_v2, %v254_v17 }
  0x1f   :  { %225 = vmatmul.f32.gmra.mxu2 %v224_v14  ;;  %v1091_v44 = vsub.f32 %v112_v9, %v1076_v33  ;;  %v190_v9 = vand.u32 4294901760, %v189_v12 }
  0x20   :  { %v240_v50 = vand.u32 4294901760, %v239_v43 }
  0x21   :  { %v246_v51 = vand.u32 4294901760, %v1091_v44  ;;  %v191_v36 = vsub.f32 %v189_v12, %v190_v9 }
  0x22   :  { %161 = vmatmul.f32.gmra.mxu0 %v160_v5  ;;  %v94_v5 = vsel %vm71_vm0, %v58_v3, 0 }
  0x23   :  { %v247_v1 = vsub.f32 %v1091_v44, %v246_v51  ;;  %v196_v25 = vand.u32 4294901760, %v94_v5  ;;  %v192_v45 = vand.u32 4294901760, %v191_v36 }
  0x24   :  { %346 = vmatmul.f32.gmra.mxu3 %v961_v35 }
  0x25   :  { %314 = vmatmul.f32.gmra.mxu1 %v992_v53  ;;  %v248_v14 = vand.u32 4294901760, %v247_v1  ;;  %v197_v37 = vsub.f32 %v94_v5, %v196_v25 }
  0x27   :  { %233 = vmatmul.f32.gmra.mxu2 %v232_v31  ;;  %v1139_v31 = vsub.f32 %v118_v8, %v1130_v18  ;;  %v198_v46 = vand.u32 4294901760, %v197_v37 }
  0x29   :  { %v262_v43 = vand.u32 4294901760, %v1139_v31 }
  0x2a   :  { %169 = vmatmul.f32.gmra.mxu0 %v168_v38  ;;  %v256_v38 = vand.u32 4294901760, %v255_v26 }
  0x2b   :  { %v263_v47 = vsub.f32 %v1139_v31, %v262_v43 }
  0x2c   :  { %350 = vmatmul.f32.gmra.mxu3 %v1006_v62 }
  0x2d   :  { %318 = vmatmul.f32.gmra.mxu1 %v1021_v7  ;;  %v264_v56 = vand.u32 4294901760, %v263_v47 }
  0x2f   :  { %241 = vmatmul.f32.gmra.mxu2 %v240_v50  ;;  %v199_v50 = vsub.f32 %v197_v37, %v198_v46 }
  0x31   :  { %v200_v57 = vand.u32 4294901760, %v199_v50 }
  0x32   :  { %177 = vmatmul.f32.gmra.mxu0 %v176_v60 }
  0x34   :  { %354 = vmatmul.f32.gmra.mxu3 %v1046_v4 }
  0x35   :  { %322 = vmatmul.f32.gmra.mxu1 %v1057_v21 }
  0x37   :  { %249 = vmatmul.f32.gmra.mxu2 %v248_v14 }
  0x3a   :  { %185 = vmatmul.f32.gmra.mxu0 %v184_v22 }
  0x3c   :  { %358 = vmatmul.f32.gmra.mxu3 %v1076_v33 }
  0x3d   :  { %326 = vmatmul.f32.gmra.mxu1 %v1085_v40 }
  0x3f   :  { %257 = vmatmul.f32.gmra.mxu2 %v256_v38 }
  0x42   :  { %193 = vmatmul.f32.gmra.mxu0 %v192_v45 }
  0x44   :  { %362 = vmatmul.f32.gmra.mxu3 %v1104_v54 }
  0x45   :  { %330 = vmatmul.f32.gmra.mxu1 %v1113_v0 }
  0x47   :  { %265 = vmatmul.f32.gmra.mxu2 %v264_v56 }
  0x4a   :  { %201 = vmatmul.f32.gmra.mxu0 %v200_v57 }
  0x4c   :  { %366 = vmatmul.f32.gmra.mxu3 %v1130_v18 }
  0x4d   :  { %334 = vmatmul.f32.gmra.mxu1 %v196_v25 }
  0x4f   :  { %396 = vmatmul.f32.vlgmr.msrb.gmra.mxu2 %v959_v34 }
  0x52   :  { %621 = vmatmul.f32.vlgmr.msrb.gmra.mxu0 %v950_v28 }
  0x54   :  { %498 = vmatmul.f32.vlgmr.msrb.gmra.mxu3 %v142_v42 }
  0x55   :  { %706 = vmatmul.f32.vlgmr.msrb.gmra.mxu1 %v950_v28 }
  0x57   :  { %401 = vmatmul.f32.gmra.mxu2 %v995_v55 }
  0x5a   :  { %625 = vmatmul.f32.gmra.mxu0 %v984_v49 }
  0x5c   :  { %504 = vmatmul.f32.gmra.mxu3 %v150_v58 }
  0x5d   :  { %710 = vmatmul.f32.gmra.mxu1 %v984_v49 }
  0x5f   :  { %406 = vmatmul.f32.gmra.mxu2 %v1003_v59 }
  0x62   :  { %629 = vmatmul.f32.gmra.mxu0 %v992_v53 }
  0x64   :  { %510 = vmatmul.f32.gmra.mxu3 %v158_v6 }
  0x65   :  { %714 = vmatmul.f32.gmra.mxu1 %v992_v53 }
  0x67   :  { %411 = vmatmul.f32.gmra.mxu2 %v1042_v13 }
  0x6a   :  { %633 = vmatmul.f32.gmra.mxu0 %v1021_v7 }
  0x6c   :  { %516 = vmatmul.f32.gmra.mxu3 %v166_v20 }
  0x6d   :  { %718 = vmatmul.f32.gmra.mxu1 %v1021_v7 }
  0x6f   :  { %416 = vmatmul.f32.gmra.mxu2 %v1073_v29 }
  0x72   :  { %637 = vmatmul.f32.gmra.mxu0 %v1057_v21 }
  0x74   :  { %522 = vmatmul.f32.gmra.mxu3 %v174_v39 }
  0x75   :  { %722 = vmatmul.f32.gmra.mxu1 %v1057_v21 }
  0x77   :  { %421 = vmatmul.f32.gmra.mxu2 %v1101_v48 }
  0x7a   :  { %641 = vmatmul.f32.gmra.mxu0 %v1085_v40 }
  0x7c   :  { %528 = vmatmul.f32.gmra.mxu3 %v182_v63 }
  0x7d   :  { %726 = vmatmul.f32.gmra.mxu1 %v1085_v40 }
  0x7f   :  { %426 = vmatmul.f32.gmra.mxu2 %v189_v12 }
  0x82   :  { %645 = vmatmul.f32.gmra.mxu0 %v1113_v0 }
  0x84   :  { %534 = vmatmul.f32.gmra.mxu3 %v190_v9 }
  0x85   :  { %730 = vmatmul.f32.gmra.mxu1 %v1113_v0 }
  0x87   :  { %431 = vmatmul.f32.gmra.mxu2 %v197_v37 }
  0x8a   :  { %649 = vmatmul.f32.gmra.mxu0 %v196_v25 }
  0x8c   :  { %540 = vmatmul.f32.gmra.mxu3 %v198_v46 }
  0x8d   :  { %734 = vmatmul.f32.gmra.mxu1 %v196_v25 }
  0x8f   :  { %436 = vmatmul.f32.gmra.mxu2 %v943_v23  ;;  %v1183_v28 = vpop.f32.mrf.mxu0 }
  0x92   :  { %v210_v34 = vpop.f32.mrf.mxu2  ;;  %v1185_v42 = vpop.f32.mrf.mxu1  ;;  %653 = vmatmul.f32.gmra.mxu0 %v929_v15 }
  0x93   :  { %v308_v12 = vadd.f32 %v1185_v42, %v1183_v28 }
  0x94   :  { %546 = vmatmul.f32.gmra.mxu3 %v206_v30 }
  0x95   :  { %738 = vmatmul.f32.gmra.mxu1 %v929_v15 }
  0x97   :  { %441 = vmatmul.f32.gmra.mxu2 %v948_v27  ;;  %v339_v49 = vpop.f32.mrf.mxu3  ;;  %v1192_v53 = vpop.f32.mrf.mxu0 }
  0x98   :  { %v1194_v55 = vadd.f32 %v339_v49, %v210_v34  ;;  %v1296_v34 = vld [vmem:[%s1413_s2] ss:$0 sm:$0xff] }
  0x9a   :  { %v218_v58 = vpop.f32.mrf.mxu2  ;;  %v1196_v59 = vpop.f32.mrf.mxu1  ;;  %657 = vmatmul.f32.gmra.mxu0 %v937_v19 }
  0x9c   :  { %552 = vmatmul.f32.gmra.mxu3 %v214_v41 }
  0x9d   :  { %742 = vmatmul.f32.gmra.mxu1 %v937_v19 }
  0x9f   :  { %446 = vmatmul.f32.gmra.mxu2 %v990_v52  ;;  %v343_v15 = vpop.f32.mrf.mxu3  ;;  %v1203_v23 = vpop.f32.mrf.mxu0 }
  0xa0   :  { %v1205_v30 = vadd.f32 %v343_v15, %v218_v58 }
  0xa2   :  { %v226_v6 = vpop.f32.mrf.mxu2  ;;  %v1207_v7 = vpop.f32.mrf.mxu1  ;;  %661 = vmatmul.f32.gmra.mxu0 %v961_v35 }
  0xa3   :  { %v316_v28 = vadd.f32 %v1207_v7, %v1203_v23 }
  0xa4   :  { %558 = vmatmul.f32.gmra.mxu3 %v222_v61 }
  0xa5   :  { %746 = vmatmul.f32.gmra.mxu1 %v961_v35 }
  0xa7   :  { %451 = vmatmul.f32.gmra.mxu2 %v1030_v10  ;;  %v347_v19 = vpop.f32.mrf.mxu3  ;;  %v1214_v27 = vpop.f32.mrf.mxu0 }
  0xa8   :  { %v1216_v41 = vadd.f32 %v347_v19, %v226_v6 }
  0xaa   :  { %v234_v13 = vpop.f32.mrf.mxu2  ;;  %v1218_v20 = vpop.f32.mrf.mxu1  ;;  %665 = vmatmul.f32.gmra.mxu0 %v1006_v62 }
  0xac   :  { %564 = vmatmul.f32.gmra.mxu3 %v230_v16  ;;  %v872_v16 = vmov 0.0  }
  0xad   :  { %750 = vmatmul.f32.gmra.mxu1 %v1006_v62  ;;  %19 = vst.msk [vmem:[#allocation2] sm:$0xff] %vm18_vm1, %v872_v16 }
  0xae   :  { %20 = vst.msk [vmem:[#allocation2 + $0x8] sm:$0xff] %vm18_vm1, %v872_v16 }
  0xaf   :  { %456 = vmatmul.f32.gmra.mxu2 %v1063_v24  ;;  %v351_v35 = vpop.f32.mrf.mxu3  ;;  %v1225_v52 = vpop.f32.mrf.mxu0  ;;  %21 = vst.msk [vmem:[#allocation2 + $0x10] sm:$0xff] %vm18_vm1, %v872_v16 }
  0xb0   :  { %v1227_v61 = vadd.f32 %v351_v35, %v234_v13  ;;  %22 = vst.msk [vmem:[#allocation2 + $0x18] sm:$0xff] %vm18_vm1, %v872_v16 }
  0xb1   :  { %23 = vst.msk [vmem:[#allocation2 + $0x20] sm:$0xff] %vm18_vm1, %v872_v16 }
  0xb2   :  { %v242_v21 = vpop.f32.mrf.mxu2  ;;  %v1229_v29 = vpop.f32.mrf.mxu1  ;;  %669 = vmatmul.f32.gmra.mxu0 %v1046_v4  ;;  %24 = vst.msk [vmem:[#allocation2 + $0x28] sm:$0xff] %vm18_vm1, %v872_v16 }
  0xb3   :  { %25 = vst.msk [vmem:[#allocation2 + $0x30] sm:$0xff] %vm18_vm1, %v872_v16 }
  0xb4   :  { %570 = vmatmul.f32.gmra.mxu3 %v238_v32  ;;  %26 = vst.msk [vmem:[#allocation2 + $0x38] sm:$0xff] %vm18_vm1, %v872_v16 }
  0xb5   :  { %754 = vmatmul.f32.gmra.mxu1 %v1046_v4  ;;  %27 = vst.msk [vmem:[#allocation2 + $0x40] sm:$0xff] %vm18_vm1, %v872_v16  ;;  %v36_v57 = vld [vmem:[#allocation2 + $0x8] sm:$0xff] }
  0xb6   :  { %28 = vst.msk [vmem:[#allocation2 + $0x48] sm:$0xff] %vm18_vm1, %v872_v16  ;;  %v37_v35 = vld [vmem:[#allocation2 + $0x10] sm:$0xff] }
  0xb7   :  { %461 = vmatmul.f32.gmra.mxu2 %v1091_v44  ;;  %v355_v62 = vpop.f32.mrf.mxu3  ;;  %v1236_v10 = vpop.f32.mrf.mxu0  ;;  %29 = vst.msk [vmem:[#allocation2 + $0x50] sm:$0xff] %vm18_vm1, %v872_v16 }
  0xb8   :  { %v1239_v39 = vadd.f32 %v355_v62, %v242_v21  ;;  %30 = vst.msk [vmem:[#allocation2 + $0x58] sm:$0xff] %vm18_vm1, %v872_v16  ;;  %v320_v21 = vadd.f32 %v1218_v20, %v1214_v27  ;;  %v38_v27 = vld [vmem:[#allocation2 + $0x18] sm:$0xff]  ;;  %v324_v20 = vadd.f32 %v1229_v29, %v1225_v52  ;;  %v39_v52 = vld [vmem:[#allocation2 + $0x20] sm:$0xff] }
  0xb9   :  { %31 = vst.msk [vmem:[#allocation2 + $0x60] sm:$0xff] %vm18_vm1, %v872_v16 }
  0xba   :  { %v250_v40 = vpop.f32.mrf.mxu2  ;;  %v1243_v24 = vpop.f32.mrf.mxu1  ;;  %673 = vmatmul.f32.gmra.mxu0 %v1076_v33  ;;  %32 = vst.msk [vmem:[#allocation2 + $0x68] sm:$0xff] %vm18_vm1, %v872_v16 }
  0xbb   :  { %33 = vst.msk [vmem:[#allocation2 + $0x70] sm:$0xff] %vm18_vm1, %v872_v16  ;;  %v328_v29 = vadd.f32 %v1243_v24, %v1236_v10  ;;  %v40_v10 = vld [vmem:[#allocation2 + $0x28] sm:$0xff] }
  0xbc   :  { %576 = vmatmul.f32.gmra.mxu3 %v246_v51  ;;  %34 = vst.msk [vmem:[#allocation2 + $0x78] sm:$0xff] %vm18_vm1, %v872_v16 }
  0xbd   :  { %758 = vmatmul.f32.gmra.mxu1 %v1076_v33 }
  0xbf   :  { %466 = vmatmul.f32.gmra.mxu2 %v1119_v2  ;;  %v359_v4 = vpop.f32.mrf.mxu3  ;;  %v1255_v32 = vpop.f32.mrf.mxu0 }
  0xc0   :  { %v1258_v48 = vadd.f32 %v359_v4, %v250_v40 }
  0xc2   :  { %v258_v44 = vpop.f32.mrf.mxu2  ;;  %v1262_v51 = vpop.f32.mrf.mxu1  ;;  %677 = vmatmul.f32.gmra.mxu0 %v1104_v54 }
  0xc3   :  { %v332_v24 = vadd.f32 %v1262_v51, %v1255_v32  ;;  %v41_v32 = vld [vmem:[#allocation2 + $0x30] sm:$0xff] }
  0xc4   :  { %582 = vmatmul.f32.gmra.mxu3 %v254_v17 }
  0xc5   :  { %762 = vmatmul.f32.gmra.mxu1 %v1104_v54 }
  0xc7   :  { %471 = vmatmul.f32.gmra.mxu2 %v1139_v31  ;;  %v363_v33 = vpop.f32.mrf.mxu3  ;;  %v1274_v60 = vpop.f32.mrf.mxu0  ;;  %v35_v31 = vld [vmem:[#allocation2] sm:$0xff] }
  0xc8   :  { %v1276_v63 = vadd.f32 %v363_v33, %v258_v44 }
  0xca   :  { %v266_v0 = vpop.f32.mrf.mxu2  ;;  %v1278_v1 = vpop.f32.mrf.mxu1  ;;  %681 = vmatmul.f32.gmra.mxu0 %v1130_v18 }
  0xcb   :  { %v336_v51 = vadd.f32 %v1278_v1, %v1274_v60  ;;  %v42_v60 = vld [vmem:[#allocation2 + $0x38] sm:$0xff] }
  0xcc   :  { %588 = vmatmul.f32.gmra.mxu3 %v262_v43 }
  0xcd   :  { %766 = vmatmul.f32.gmra.mxu1 %v1130_v18  ;;  %v312_v18 = vadd.f32 %v1196_v59, %v1192_v53 }
  0xcf   :  { %v367_v54 = vpop.f32.mrf.mxu3  ;;  %v622_v2 = vpop.f32.mrf.mxu0 }
  0xd0   :  { %v1284_v8 = vadd.f32 %v367_v54, %v266_v0 }
  0xd2   :  { %v397_v3 = vpop.f32.mrf.mxu2  ;;  %v707_v11 = vpop.f32.mrf.mxu1 }
  0xd3   :  { %v398_v14 = vadd.f32 %v397_v3, %v308_v12 }
  0xd7   :  { %v499_v17 = vpop.f32.mrf.mxu3  ;;  %v626_v5 = vpop.f32.mrf.mxu0 }
  0xd8   :  { %v500_v22 = vadd.f32 %v499_v17, %v398_v14 }
  0xda   :  { %v402_v9 = vpop.f32.mrf.mxu2  ;;  %v623_v25 = vadd.f32 %v622_v2, %v500_v22  ;;  %v711_v26 = vpop.f32.mrf.mxu1 }
  0xdb   :  { %v403_v37 = vadd.f32 %v402_v9, %v312_v18 }
  0xdc   :  { %v708_v36 = vadd.f32 %v707_v11, %v623_v25 }
  0xde   :  { %v770_v38 = vadd.f32 %v708_v36, %v35_v31 }
  0xdf   :  { %v505_v43 = vpop.f32.mrf.mxu3  ;;  %v630_v45 = vpop.f32.mrf.mxu0 }
  0xe0   :  { %787 = vst.msk [vmem:[#allocation2] sm:$0xff] %vm18_vm1, %v770_v38  ;;  %v506_v46 = vadd.f32 %v505_v43, %v403_v37 }
  0xe2   :  { %v407_v47 = vpop.f32.mrf.mxu2  ;;  %v627_v50 = vadd.f32 %v626_v5, %v506_v46  ;;  %v715_v56 = vpop.f32.mrf.mxu1 }
  0xe3   :  { %v408_v49 = vadd.f32 %v407_v47, %v316_v28 }
  0xe4   :  { %v712_v42 = vadd.f32 %v711_v26, %v627_v50 }
  0xe6   :  { %v771_v53 = vadd.f32 %v712_v42, %v36_v57 }
  0xe7   :  { %v806_v58 = vld [vmem:[#allocation2] sm:$0xff]  ;;  %v511_v59 = vpop.f32.mrf.mxu3  ;;  %v634_v15 = vpop.f32.mrf.mxu0 }
  0xe8   :  { %v826_v6 = vadd.f32 %v1296_v34, %v806_v58  ;;  %788 = vst.msk [vmem:[#allocation2 + $0x8] sm:$0xff] %vm18_vm1, %v771_v53  ;;  %v512_v19 = vadd.f32 %v511_v59, %v408_v49 }
  0xea   :  { %842 = vst.msk [vmem:[%s1414_s3] sm:$0xff] %vm18_vm1, %v826_v6  ;;  %v412_v23 = vpop.f32.mrf.mxu2  ;;  %v631_v7 = vadd.f32 %v630_v45, %v512_v19  ;;  %v719_v13 = vpop.f32.mrf.mxu1 }
  0xeb   :  { %v413_v16 = vadd.f32 %v412_v23, %v320_v21 }
  0xec   :  { %v716_v62 = vadd.f32 %v715_v56, %v631_v7 }
  0xee   :  { %v772_v40 = vadd.f32 %v716_v62, %v37_v35 }
  0xef   :  { %v807_v4 = vld [vmem:[#allocation2 + $0x8] sm:$0xff]  ;;  %v517_v44 = vpop.f32.mrf.mxu3  ;;  %v638_v33 = vpop.f32.mrf.mxu0 }
  0xf0   :  { %v827_v0 = vadd.f32 %v1296_v34, %v807_v4  ;;  %789 = vst.msk [vmem:[#allocation2 + $0x10] sm:$0xff] %vm18_vm1, %v772_v40  ;;  %v518_v54 = vadd.f32 %v517_v44, %v413_v16 }
  0xf2   :  { %843 = vst.msk [vmem:[%s1414_s3 + $0x8] sm:$0xff] %vm18_vm1, %v827_v0  ;;  %v417_v2 = vpop.f32.mrf.mxu2  ;;  %v635_v3 = vadd.f32 %v634_v15, %v518_v54  ;;  %v723_v11 = vpop.f32.mrf.mxu1 }
  0xf3   :  { %v418_v14 = vadd.f32 %v417_v2, %v324_v20 }
  0xf4   :  { %v720_v12 = vadd.f32 %v719_v13, %v635_v3 }
  0xf6   :  { %v773_v17 = vadd.f32 %v720_v12, %v38_v27 }
  0xf7   :  { %v808_v5 = vld [vmem:[#allocation2 + $0x10] sm:$0xff]  ;;  %v523_v22 = vpop.f32.mrf.mxu3  ;;  %v642_v9 = vpop.f32.mrf.mxu0 }
  0xf8   :  { %v828_v25 = vadd.f32 %v1296_v34, %v808_v5  ;;  %790 = vst.msk [vmem:[#allocation2 + $0x18] sm:$0xff] %vm18_vm1, %v773_v17  ;;  %v524_v26 = vadd.f32 %v523_v22, %v418_v14 }
  0xfa   :  { %844 = vst.msk [vmem:[%s1414_s3 + $0x10] sm:$0xff] %vm18_vm1, %v828_v25  ;;  %v422_v31 = vpop.f32.mrf.mxu2  ;;  %v639_v18 = vadd.f32 %v638_v33, %v524_v26  ;;  %v727_v36 = vpop.f32.mrf.mxu1  ;;  %v43_v26 = vld [vmem:[#allocation2 + $0x40] sm:$0xff] }
  0xfb   :  { %v423_v38 = vadd.f32 %v422_v31, %v328_v29 }
  0xfc   :  { %v724_v37 = vadd.f32 %v723_v11, %v639_v18 }
  0xfe   :  { %v774_v43 = vadd.f32 %v724_v37, %v39_v52 }
  0xff   :  { %v809_v45 = vld [vmem:[#allocation2 + $0x18] sm:$0xff]  ;;  %v529_v46 = vpop.f32.mrf.mxu3  ;;  %v646_v47 = vpop.f32.mrf.mxu0 }
 0x100   :  { %v829_v50 = vadd.f32 %v1296_v34, %v809_v45  ;;  %791 = vst.msk [vmem:[#allocation2 + $0x20] sm:$0xff] %vm18_vm1, %v774_v43  ;;  %v530_v56 = vadd.f32 %v529_v46, %v423_v38 }
 0x102   :  { %845 = vst.msk [vmem:[%s1414_s3 + $0x18] sm:$0xff] %vm18_vm1, %v829_v50  ;;  %v427_v57 = vpop.f32.mrf.mxu2  ;;  %v643_v28 = vadd.f32 %v642_v9, %v530_v56  ;;  %v731_v42 = vpop.f32.mrf.mxu1 }
 0x103   :  { %v428_v53 = vadd.f32 %v427_v57, %v332_v24 }
 0x104   :  { %v728_v49 = vadd.f32 %v727_v36, %v643_v28 }
 0x106   :  { %v775_v58 = vadd.f32 %v728_v49, %v40_v10 }
 0x107   :  { %v810_v59 = vld [vmem:[#allocation2 + $0x20] sm:$0xff]  ;;  %v535_v15 = vpop.f32.mrf.mxu3  ;;  %v650_v6 = vpop.f32.mrf.mxu0 }
 0x108   :  { %v830_v19 = vadd.f32 %v1296_v34, %v810_v59  ;;  %792 = vst.msk [vmem:[#allocation2 + $0x28] sm:$0xff] %vm18_vm1, %v775_v58  ;;  %v536_v23 = vadd.f32 %v535_v15, %v428_v53  ;;  %v45_v59 = vld [vmem:[#allocation2 + $0x50] sm:$0xff] }
 0x10a   :  { %846 = vst.msk [vmem:[%s1414_s3 + $0x20] sm:$0xff] %vm18_vm1, %v830_v19  ;;  %v432_v7 = vpop.f32.mrf.mxu2  ;;  %v647_v13 = vadd.f32 %v646_v47, %v536_v23  ;;  %v735_v35 = vpop.f32.mrf.mxu1  ;;  %v44_v47 = vld [vmem:[#allocation2 + $0x48] sm:$0xff] }
 0x10b   :  { %v433_v62 = vadd.f32 %v432_v7, %v336_v51 }
 0x10c   :  { %v732_v21 = vadd.f32 %v731_v42, %v647_v13 }
 0x10e   :  { %v776_v16 = vadd.f32 %v732_v21, %v41_v32  ;;  %v46_v21 = vld [vmem:[#allocation2 + $0x58] sm:$0xff] }
 0x10f   :  { %v811_v40 = vld [vmem:[#allocation2 + $0x28] sm:$0xff]  ;;  %v541_v4 = vpop.f32.mrf.mxu3  ;;  %v654_v44 = vpop.f32.mrf.mxu0 }
 0x110   :  { %v831_v33 = vadd.f32 %v1296_v34, %v811_v40  ;;  %793 = vst.msk [vmem:[#allocation2 + $0x30] sm:$0xff] %vm18_vm1, %v776_v16  ;;  %v542_v0 = vadd.f32 %v541_v4, %v433_v62 }
 0x112   :  { %847 = vst.msk [vmem:[%s1414_s3 + $0x28] sm:$0xff] %vm18_vm1, %v831_v33  ;;  %v437_v54 = vpop.f32.mrf.mxu2  ;;  %v651_v2 = vadd.f32 %v650_v6, %v542_v0  ;;  %v739_v3 = vpop.f32.mrf.mxu1 }
 0x113   :  { %v438_v11 = vadd.f32 %v437_v54, %v1194_v55 }
 0x114   :  { %v736_v1 = vadd.f32 %v735_v35, %v651_v2 }
 0x116   :  { %v777_v27 = vadd.f32 %v736_v1, %v42_v60 }
 0x117   :  { %v812_v20 = vld [vmem:[#allocation2 + $0x30] sm:$0xff]  ;;  %v547_v12 = vpop.f32.mrf.mxu3  ;;  %v658_v14 = vpop.f32.mrf.mxu0 }
 0x118   :  { %v832_v17 = vadd.f32 %v1296_v34, %v812_v20  ;;  %794 = vst.msk [vmem:[#allocation2 + $0x38] sm:$0xff] %vm18_vm1, %v777_v27  ;;  %v548_v5 = vadd.f32 %v547_v12, %v438_v11 }
 0x11a   :  { %848 = vst.msk [vmem:[%s1414_s3 + $0x30] sm:$0xff] %vm18_vm1, %v832_v17  ;;  %v442_v22 = vpop.f32.mrf.mxu2  ;;  %v655_v9 = vadd.f32 %v654_v44, %v548_v5  ;;  %v743_v25 = vpop.f32.mrf.mxu1 }
 0x11b   :  { %v443_v55 = vadd.f32 %v442_v22, %v1205_v30 }
 0x11c   :  { %v740_v31 = vadd.f32 %v739_v3, %v655_v9  ;;  %v47_v3 = vld [vmem:[#allocation2 + $0x60] sm:$0xff]  ;;  %v48_v9 = vld [vmem:[#allocation2 + $0x68] sm:$0xff] }
 0x11e   :  { %v778_v18 = vadd.f32 %v740_v31, %v43_v26 }
 0x11f   :  { %v813_v36 = vld [vmem:[#allocation2 + $0x38] sm:$0xff]  ;;  %v553_v52 = vpop.f32.mrf.mxu3  ;;  %v662_v29 = vpop.f32.mrf.mxu0 }
 0x120   :  { %v833_v37 = vadd.f32 %v1296_v34, %v813_v36  ;;  %795 = vst.msk [vmem:[#allocation2 + $0x40] sm:$0xff] %vm18_vm1, %v778_v18  ;;  %v554_v38 = vadd.f32 %v553_v52, %v443_v55 }
 0x122   :  { %849 = vst.msk [vmem:[%s1414_s3 + $0x38] sm:$0xff] %vm18_vm1, %v833_v37  ;;  %v447_v43 = vpop.f32.mrf.mxu2  ;;  %v659_v45 = vadd.f32 %v658_v14, %v554_v38  ;;  %v747_v46 = vpop.f32.mrf.mxu1 }
 0x123   :  { %v448_v30 = vadd.f32 %v447_v43, %v1216_v41  ;;  %v49_v43 = vld [vmem:[#allocation2 + $0x70] sm:$0xff] }
 0x124   :  { %v744_v50 = vadd.f32 %v743_v25, %v659_v45 }
 0x126   :  { %v779_v56 = vadd.f32 %v744_v50, %v44_v47 }
 0x127   :  { %v814_v57 = vld [vmem:[#allocation2 + $0x40] sm:$0xff]  ;;  %v559_v28 = vpop.f32.mrf.mxu3  ;;  %v666_v42 = vpop.f32.mrf.mxu0 }
 0x128   :  { %v834_v10 = vadd.f32 %v1296_v34, %v814_v57  ;;  %796 = vst.msk [vmem:[#allocation2 + $0x48] sm:$0xff] %vm18_vm1, %v779_v56  ;;  %v560_v24 = vadd.f32 %v559_v28, %v448_v30 }
 0x12a   :  { %850 = vst.msk [vmem:[%s1414_s3 + $0x40] sm:$0xff] %vm18_vm1, %v834_v10  ;;  %v452_v49 = vpop.f32.mrf.mxu2  ;;  %v663_v53 = vadd.f32 %v662_v29, %v560_v24  ;;  %v751_v58 = vpop.f32.mrf.mxu1  ;;  %v50_v10 = vld [vmem:[#allocation2 + $0x78] sm:$0xff] }
 0x12b   :  { %v453_v41 = vadd.f32 %v452_v49, %v1227_v61 }
 0x12c   :  { %v748_v15 = vadd.f32 %v747_v46, %v663_v53 }
 0x12e   :  { %v780_v6 = vadd.f32 %v748_v15, %v45_v59 }
 0x12f   :  { %v815_v19 = vld [vmem:[#allocation2 + $0x48] sm:$0xff]  ;;  %v565_v23 = vpop.f32.mrf.mxu3  ;;  %v670_v35 = vpop.f32.mrf.mxu0 }
 0x130   :  { %v835_v7 = vadd.f32 %v1296_v34, %v815_v19  ;;  %797 = vst.msk [vmem:[#allocation2 + $0x50] sm:$0xff] %vm18_vm1, %v780_v6  ;;  %v566_v13 = vadd.f32 %v565_v23, %v453_v41 }
 0x132   :  { %851 = vst.msk [vmem:[%s1414_s3 + $0x48] sm:$0xff] %vm18_vm1, %v835_v7  ;;  %v457_v32 = vpop.f32.mrf.mxu2  ;;  %v667_v51 = vadd.f32 %v666_v42, %v566_v13  ;;  %v755_v62 = vpop.f32.mrf.mxu1 }
 0x133   :  { %v458_v61 = vadd.f32 %v457_v32, %v1239_v39 }
 0x134   :  { %v752_v16 = vadd.f32 %v751_v58, %v667_v51 }
 0x136   :  { %v781_v40 = vadd.f32 %v752_v16, %v46_v21 }
 0x137   :  { %v816_v4 = vld [vmem:[#allocation2 + $0x50] sm:$0xff]  ;;  %v571_v44 = vpop.f32.mrf.mxu3  ;;  %v674_v60 = vpop.f32.mrf.mxu0 }
 0x138   :  { %v836_v33 = vadd.f32 %v1296_v34, %v816_v4  ;;  %798 = vst.msk [vmem:[#allocation2 + $0x58] sm:$0xff] %vm18_vm1, %v781_v40  ;;  %v572_v0 = vadd.f32 %v571_v44, %v458_v61 }
 0x13a   :  { %852 = vst.msk [vmem:[%s1414_s3 + $0x50] sm:$0xff] %vm18_vm1, %v836_v33  ;;  %v462_v54 = vpop.f32.mrf.mxu2  ;;  %v671_v2 = vadd.f32 %v670_v35, %v572_v0  ;;  %v759_v11 = vpop.f32.mrf.mxu1 }
 0x13b   :  { %v463_v39 = vadd.f32 %v462_v54, %v1258_v48 }
 0x13c   :  { %v756_v1 = vadd.f32 %v755_v62, %v671_v2 }
 0x13e   :  { %v782_v27 = vadd.f32 %v756_v1, %v47_v3 }
 0x13f   :  { %v817_v20 = vld [vmem:[#allocation2 + $0x58] sm:$0xff]  ;;  %v577_v12 = vpop.f32.mrf.mxu3  ;;  %v678_v26 = vpop.f32.mrf.mxu0 }
 0x140   :  { %v837_v14 = vadd.f32 %v1296_v34, %v817_v20  ;;  %799 = vst.msk [vmem:[#allocation2 + $0x60] sm:$0xff] %vm18_vm1, %v782_v27  ;;  %v578_v17 = vadd.f32 %v577_v12, %v463_v39 }
 0x142   :  { %853 = vst.msk [vmem:[%s1414_s3 + $0x58] sm:$0xff] %vm18_vm1, %v837_v14  ;;  %v467_v5 = vpop.f32.mrf.mxu2  ;;  %v675_v22 = vadd.f32 %v674_v60, %v578_v17  ;;  %v763_v36 = vpop.f32.mrf.mxu1 }
 0x143   :  { %v468_v48 = vadd.f32 %v467_v5, %v1276_v63 }
 0x144   :  { %v760_v25 = vadd.f32 %v759_v11, %v675_v22 }
 0x146   :  { %v783_v31 = vadd.f32 %v760_v25, %v48_v9 }
 0x147   :  { %v818_v55 = vld [vmem:[#allocation2 + $0x60] sm:$0xff]  ;;  %v583_v18 = vpop.f32.mrf.mxu3  ;;  %v682_v30 = vpop.f32.mrf.mxu0 }
 0x148   :  { %v838_v52 = vadd.f32 %v1296_v34, %v818_v55  ;;  %800 = vst.msk [vmem:[#allocation2 + $0x68] sm:$0xff] %vm18_vm1, %v783_v31  ;;  %v584_v29 = vadd.f32 %v583_v18, %v468_v48 }
 0x14a   :  { %854 = vst.msk [vmem:[%s1414_s3 + $0x60] sm:$0xff] %vm18_vm1, %v838_v52  ;;  %v679_v37 = vadd.f32 %v678_v26, %v584_v29  ;;  %v472_v38 = vpop.f32.mrf.mxu2  ;;  %v767_v28 = vpop.f32.mrf.mxu1 }
 0x14b   :  { %v473_v63 = vadd.f32 %v472_v38, %v1284_v8 }
 0x14c   :  { %v764_v45 = vadd.f32 %v763_v36, %v679_v37 }
 0x14e   :  { %v784_v46 = vadd.f32 %v764_v45, %v49_v43 }
 0x14f   :  { %v819_v47 = vld [vmem:[#allocation2 + $0x68] sm:$0xff]  ;;  %v589_v50 = vpop.f32.mrf.mxu3 }
 0x150   :  { %v839_v56 = vadd.f32 %v1296_v34, %v819_v47  ;;  %801 = vst.msk [vmem:[#allocation2 + $0x70] sm:$0xff] %vm18_vm1, %v784_v46  ;;  %v590_v57 = vadd.f32 %v589_v50, %v473_v63 }
 0x152   :  { %855 = vst.msk [vmem:[%s1414_s3 + $0x68] sm:$0xff] %vm18_vm1, %v839_v56  ;;  %v683_v42 = vadd.f32 %v682_v30, %v590_v57 }
 0x154   :  { %v768_v24 = vadd.f32 %v767_v28, %v683_v42 }
 0x156   :  { %v785_v49 = vadd.f32 %v768_v24, %v50_v10 }
 0x157   :  { %v820_v8 = vld [vmem:[#allocation2 + $0x70] sm:$0xff] }
 0x158   :  { %v840_v53 = vadd.f32 %v1296_v34, %v820_v8  ;;  %802 = vst.msk [vmem:[#allocation2 + $0x78] sm:$0xff] %vm18_vm1, %v785_v49 }
 0x15a   :  { %856 = vst.msk [vmem:[%s1414_s3 + $0x70] sm:$0xff] %vm18_vm1, %v840_v53 }
 0x15f   :  { %v821_v58 = vld [vmem:[#allocation2 + $0x78] sm:$0xff] }
 0x160   :  { %v841_v59 = vadd.f32 %v1296_v34, %v821_v58 }
 0x162   :  { %857 = vst.msk [vmem:[%s1414_s3 + $0x78] sm:$0xff] %vm18_vm1, %v841_v59 }

</bundles_post_ra>
